<compile_context>
chip_gen: v6e
topology: v6e:2x2x1
jax: 0.10.0
libtpu: 0.0.40
codegen_flags: <defaults>
</compile_context>

<pallas_src>
import functools

import jax
import jax.numpy as jnp
from jax.experimental import pallas as pl
from jax.experimental.pallas import tpu as pltpu

LANES = 128
CHUNK_ROWS = 512                       # in-kernel compute chunk (mult. of 8/16/32)
TARGET_STEP_BYTES = 6 * 1024 * 1024    # ~HBM bytes per grid step (2 inputs + f32 out)
VMEM_LIMIT_BYTES = 32 * 1024 * 1024    # covers v5e's 16 MiB default, safe on v7x


def _pow_no_eup(x, gamma):
    """x ** gamma via repeated multiplies for small non-negative integer gamma.

    Default gamma=2.0 costs a single VPU multiply.  Non-integer gamma falls back
    to jnp.power (exp+log on the EUP); on v7x that path is ~2-3x slower per
    element because the single EUP slot becomes the binding unit.
    """
    g = float(gamma)
    if g == g and g >= 0.0 and g == int(g) and int(g) <= 8:
        gi = int(g)
        if gi == 0:
            return jnp.ones_like(x)
        result = None
        base = x
        e = gi
        while e:
            if e & 1:
                result = base if result is None else result * base
            e >>= 1
            if e:
                base = base * base
        return result
    return jnp.power(x, gamma)  # TODO(synk): non-integer gamma is EUP-bound on v7x.


def _focal_kernel(pred_ref, true_ref, out_ref, *, gamma, alpha, chunk_rows,
                  num_chunks):
    """Per-element focal-robust loss on one (rows_per_block, 128) block.

    The block is processed in `chunk_rows`-row chunks with static offsets
    (fully unrolled), keeping live elementwise temporaries chunk-sized even for
    multi-MiB DMA blocks.  Ragged last blocks are handled by Pallas partial
    blocks (the extra rows computed here are dropped by the masked writeback).
    """
    thresh = jnp.float32(1.0 - alpha)
    for c in range(num_chunks):           # static offsets -> unrolled straight-line code
        r0 = c * chunk_rows
        p = pred_ref[pl.ds(r0, chunk_rows), :].astype(jnp.float32)
        t = true_ref[pl.ds(r0, chunk_rows), :]
        # torch: y_true.view(-1,1).long() -> one-hot scatter -> select column.
        # A truncating int cast == .long(); index 1 selects p, otherwise 1 - p.
        is_one = t.astype(jnp.int32) == 1
        p_t = jnp.where(is_one, p, 1.0 - p)
        # Upper bound 1 - 1e-8 rounds to 1.0 in f32 — same as torch.clamp on f32.
        p_t = jnp.clip(p_t, 1e-8, 1.0 - 1e-8)
        focus = _pow_no_eup(1.0 - p_t, gamma)
        focus = jnp.where(focus < thresh, focus, 0.0)
        out_ref[pl.ds(r0, chunk_rows), :] = -focus * jnp.log(p_t)


def _run_kernel(p2, t2, gamma, alpha):
    """Per-element losses for lane-dense (m, 128) inputs -> (m, 128) float32."""
    m = p2.shape[0]

    # Dtype-aware block size: ~TARGET_STEP_BYTES of HBM traffic per grid step.
    bytes_per_row = (p2.dtype.itemsize + t2.dtype.itemsize + 4) * LANES
    rows_big = max(CHUNK_ROWS,
                   (TARGET_STEP_BYTES // bytes_per_row) // CHUNK_ROWS * CHUNK_ROWS)
    if m > CHUNK_ROWS:
        rows_per_block = min(rows_big, (m // CHUNK_ROWS) * CHUNK_ROWS)
        chunk_rows = CHUNK_ROWS
    else:
        rows_per_block = m          # single block equal to the full row extent
        chunk_rows = m
    num_chunks = rows_per_block // chunk_rows
    num_blocks = pl.cdiv(m, rows_per_block)

    kernel = functools.partial(_focal_kernel, gamma=gamma, alpha=alpha,
                               chunk_rows=chunk_rows, num_chunks=num_chunks)

    n = m * LANES
    cost = pl.CostEstimate(
        flops=10 * n,
        transcendentals=n,
        bytes_accessed=int(n * (p2.dtype.itemsize + t2.dtype.itemsize + 4)))

    return pl.pallas_call(
        kernel,
        out_shape=jax.ShapeDtypeStruct((m, LANES), jnp.float32),
        grid_spec=pltpu.PrefetchScalarGridSpec(
            num_scalar_prefetch=0,
            grid=(num_blocks,),
            in_specs=[
                pl.BlockSpec((rows_per_block, LANES), lambda i: (i, 0)),
                pl.BlockSpec((rows_per_block, LANES), lambda i: (i, 0)),
            ],
            out_specs=pl.BlockSpec((rows_per_block, LANES), lambda i: (i, 0)),
        ),
        compiler_params=pltpu.CompilerParams(
            # Row blocks are fully independent, so the axis is safe to shard
            # across v7x's two TensorCores.
            # TODO(synk): profile TC1 on v7x; if the single "parallel" axis is
            # not auto-sharded, add an explicit 2-core split (CORE_PARALLEL).
            dimension_semantics=("parallel",),
            vmem_limit_bytes=VMEM_LIMIT_BYTES),
        cost_estimate=cost,
    )(p2, t2)


def _elementwise_loss_jnp(p, t, gamma, alpha):
    """Plain-jnp focal-robust loss (used only for the <128-element ragged tail)."""
    p = p.astype(jnp.float32)
    p_t = jnp.where(t.astype(jnp.int32) == 1, p, 1.0 - p)
    p_t = jnp.clip(p_t, 1e-8, 1.0 - 1e-8)
    focus = jnp.power(1.0 - p_t, jnp.float32(gamma))
    focus = jnp.where(focus < 1.0 - alpha, focus, 0.0)
    return -focus * jnp.log(p_t)


def focal_robust_instance_loss(y_pred, y_true, pixel_weights=1, *,
                               gamma=2.0, alpha=0.1):
    """Pallas port of FocalRobustInstanceLoss.forward.

    Returns the per-element losses, shape (N, 1) float32 with N = y_pred.size.
    `pixel_weights` is accepted for API parity but — exactly like the PyTorch
    module — is unused by the forward pass.
    """
    del pixel_weights  # unused by the reference forward()

    n = y_pred.size
    p_flat = y_pred.reshape(-1)
    t_flat = y_true.reshape(-1)
    n_main = (n // LANES) * LANES

    pieces = []
    if n_main:
        m = n_main // LANES
        # Zero-copy reshape when n is already a multiple of 128 (common case).
        p2 = p_flat[:n_main].reshape(m, LANES)
        t2 = t_flat[:n_main].reshape(m, LANES)
        pieces.append(_run_kernel(p2, t2, gamma, alpha).reshape(-1))
    if n_main != n:
        # <128-element tail: plain jnp instead of padding (and thereby copying)
        # both full input arrays.
        pieces.append(_elementwise_loss_jnp(p_flat[n_main:], t_flat[n_main:],
                                            gamma, alpha))
    loss = pieces[0] if len(pieces) == 1 else jnp.concatenate(pieces)
    return loss.reshape(-1, 1)


def _reference(y_pred, y_true, gamma=2.0, alpha=0.1):
    """Direct jnp transcription of the PyTorch forward (per-element losses)."""
    p = y_pred.reshape(-1).astype(jnp.float32)
    t = y_true.reshape(-1)
    p_t = jnp.where(t.astype(jnp.int32) == 1, p, 1.0 - p)
    p_t = jnp.clip(p_t, 1e-8, 1.0 - 1e-8)
    focus = jnp.power(1.0 - p_t, gamma)
    focus = jnp.where(focus < 1.0 - alpha, focus, 0.0)
    return (-focus * jnp.log(p_t)).reshape(-1, 1)


if __name__ == "__main__":
    key = jax.random.PRNGKey(0)
    k1, k2, k3, k4 = jax.random.split(key, 4)

    # Shapes implied by the module: (batch, channels, height, width).
    B, C, H, W = 2, 4, 16, 16
    y_pred = jax.random.uniform(k1, (B, C, H, W), dtype=jnp.float32)
    y_true = (jax.random.uniform(k2, (B, C, H, W)) > 0.5).astype(jnp.float32)

    out = jax.block_until_ready(focal_robust_instance_loss(y_pred, y_true))
    ref = jax.block_until_ready(_reference(y_pred, y_true))
    assert out.shape == (B * C * H * W, 1), out.shape
    assert jnp.allclose(out, ref, rtol=1e-5, atol=1e-6), \
        float(jnp.max(jnp.abs(out - ref)))

    # Ragged case (numel % 128 != 0): aligned prefix via the kernel, tail in jnp.
    yp2 = jax.random.uniform(k3, (3, 5, 7, 9), dtype=jnp.float32)
    yt2 = (jax.random.uniform(k4, (3, 5, 7, 9)) > 0.5).astype(jnp.float32)
    out2 = jax.block_until_ready(focal_robust_instance_loss(yp2, yt2))
    ref2 = jax.block_until_ready(_reference(yp2, yt2))
    assert out2.shape == (3 * 5 * 7 * 9, 1), out2.shape
    assert jnp.allclose(out2, ref2, rtol=1e-5, atol=1e-6), \
        float(jnp.max(jnp.abs(out2 - ref2)))

    print("KERNEL_OK")
</pallas_src>

<mosaic_0001>
module attributes {stable_mosaic.version = 11 : i64} {
  func.func @_focal_kernel(%arg0: i32, %arg1: memref<16x128xf32, #tpu.memory_space<vmem>>, %arg2: memref<16x128xf32, #tpu.memory_space<vmem>>, %arg3: memref<16x128xf32, #tpu.memory_space<vmem>>) attributes {dimension_semantics = [#tpu.dimension_semantics<parallel>], iteration_bounds = array<i64: 1>, scalar_prefetch = 0 : i64, scratch_operands = 0 : i64, tpu.core_type = #tpu.core_type<tc>, window_params = [{transform_indices = @transform_0, window_bounds = array<i64: 16, 128>}, {transform_indices = @transform_1, window_bounds = array<i64: 16, 128>}, {transform_indices = @transform_2, window_bounds = array<i64: 16, 128>}]} {
    %c0 = arith.constant 0 : index
    %c0_0 = arith.constant 0 : index
    %0 = vector.load %arg1[%c0, %c0_0] : memref<16x128xf32, #tpu.memory_space<vmem>>, vector<16x128xf32>
    %c0_1 = arith.constant 0 : index
    %c0_2 = arith.constant 0 : index
    %1 = vector.load %arg2[%c0_1, %c0_2] : memref<16x128xf32, #tpu.memory_space<vmem>>, vector<16x128xf32>
    %2 = arith.fptosi %1 : vector<16x128xf32> to vector<16x128xi32>
    %c1_i32 = arith.constant 1 : i32
    %3 = vector.broadcast %c1_i32 : i32 to vector<16x128xi32>
    %4 = arith.cmpi eq, %2, %3 : vector<16x128xi32>
    %cst = arith.constant 1.000000e+00 : f32
    %5 = vector.broadcast %cst : f32 to vector<16x128xf32>
    %6 = arith.subf %5, %0 : vector<16x128xf32>
    %7 = arith.select %4, %0, %6 : vector<16x128xi1>, vector<16x128xf32>
    %cst_3 = arith.constant 9.99999993E-9 : f32
    %cst_4 = arith.constant 1.000000e+00 : f32
    %8 = vector.broadcast %cst_3 : f32 to vector<16x128xf32>
    %9 = arith.maximumf %8, %7 : vector<16x128xf32>
    %10 = vector.broadcast %cst_4 : f32 to vector<16x128xf32>
    %11 = arith.minimumf %10, %9 : vector<16x128xf32>
    %cst_5 = arith.constant 1.000000e+00 : f32
    %12 = vector.broadcast %cst_5 : f32 to vector<16x128xf32>
    %13 = arith.subf %12, %11 : vector<16x128xf32>
    %14 = arith.mulf %13, %13 : vector<16x128xf32>
    %cst_6 = arith.constant 0.899999976 : f32
    %15 = vector.broadcast %cst_6 : f32 to vector<16x128xf32>
    %16 = arith.cmpf olt, %14, %15 : vector<16x128xf32>
    %cst_7 = arith.constant 0.000000e+00 : f32
    %17 = vector.broadcast %cst_7 : f32 to vector<16x128xf32>
    %18 = arith.select %16, %14, %17 : vector<16x128xi1>, vector<16x128xf32>
    %cst_8 = arith.constant 0.000000e+00 : f32
    %19 = vector.broadcast %cst_8 : f32 to vector<16x128xf32>
    %20 = arith.subf %19, %18 : vector<16x128xf32>
    %21 = math.log %11 : vector<16x128xf32>
    %22 = arith.mulf %20, %21 : vector<16x128xf32>
    %c0_9 = arith.constant 0 : index
    %c0_10 = arith.constant 0 : index
    %23 = vector.load %arg3[%c0_9, %c0_10] : memref<16x128xf32, #tpu.memory_space<vmem>>, vector<16x128xf32>
    tpu.vector_store %arg3[%c0_9, %c0_10], %22 {strides = array<i32>} : memref<16x128xf32, #tpu.memory_space<vmem>>, vector<16x128xf32>,
    return
  }
  func.func @transform_0(%arg0: i32) -> (i32, i32) {
    %c0_i32 = arith.constant 0 : i32
    %c0_i32_0 = arith.constant 0 : i32
    return %arg0, %c0_i32 : i32, i32
  }
  func.func @transform_1(%arg0: i32) -> (i32, i32) {
    %c0_i32 = arith.constant 0 : i32
    %c0_i32_0 = arith.constant 0 : i32
    return %arg0, %c0_i32 : i32, i32
  }
  func.func @transform_2(%arg0: i32) -> (i32, i32) {
    %c0_i32 = arith.constant 0 : i32
    %c0_i32_0 = arith.constant 0 : i32
    return %arg0, %c0_i32 : i32, i32
  }
}

</mosaic_0001>

<bundles_post_ra>
// kernel: tpu_custom_call.1
= control target key start
LH: loop header
LB: loop body
LE: loop exit
PB: predicated region body
PF: predicated region fallthrough
CT: control target
= control target key end

     0   :  { %7 = vsyncpa [#allocation3], 0  ;;  %s209_s0 = inlined_call_operand.hbm [shape: f32[16,128], index: 0, kind: input, shape index: {}]   ;;  %s210_s1 = inlined_call_operand.hbm [shape: f32[16,128], index: 1, kind: input, shape index: {}]   ;;  %s211_s2 = inlined_call_operand.hbm [shape: f32[16,128], index: 2, kind: output, shape index: {}]  }
   0x1   :  { %8 = vsyncpa [#allocation6], 0 }
   0x2   :  { %9 = vsyncpa [#allocation4], 0  ;;  %s171_s9 = smov [#allocation2]  }
   0x3   :  { %s15_s10 = sshll.u32 %s171_s9, 4  ;;  %s16_s10 = int_to_ptr.vmem [resolvable:$true] %s15_s10 }
   0x4   :  { %s113_s11 = scalar_lea.vmem %s16_s10, 256  ;;  %p118_p1 = scmp.lt.s32.totalorder %s16_s10, %s16_s10 }
   0x5   :  { %p114_p0 = scmp.ne.s32.totalorder %s16_s10, %s113_s11  ;;  %p119_p2 = scmp.lt.s32.totalorder %s113_s11, %s113_s11 }
   0x7   :  { %p120_p3 = por %p119_p2, %p118_p1 }
   0x9   :  { %p121_p4 = pnand %p120_p3, %p114_p0 }
   0xb   :  { %124 = shalt.err (!%p121_p4)
}
   0xc   :  { %s172_s12 = smov 128   ;;  %s173_s13 = smov 8  }
   0xd   :  { %21 = dma.hbm_to_vmem [thread:$0]  %s209_s0, 256, %s16_s10, [#allocation3], %s172_s12, %s172_s12, %s173_s13  }
   0xe   :  { %s174_s16 = smov [#allocation5]  }
   0xf   :  { %s27_s17 = sshll.u32 %s174_s16, 4  ;;  %s28_s17 = int_to_ptr.vmem [resolvable:$true] %s27_s17 }
  0x10   :  { %s133_s18 = scalar_lea.vmem %s28_s17, 256  ;;  %p138_p6 = scmp.lt.s32.totalorder %s28_s17, %s28_s17 }
  0x11   :  { %p134_p5 = scmp.ne.s32.totalorder %s28_s17, %s133_s18  ;;  %p139_p7 = scmp.lt.s32.totalorder %s133_s18, %s133_s18 }
  0x13   :  { %p140_p8 = por %p139_p7, %p138_p6 }
  0x15   :  { %p141_p9 = pnand %p140_p8, %p134_p5 }
  0x17   :  { %144 = shalt.err (!%p141_p9)
}
  0x18   :  { %33 = dma.hbm_to_vmem [thread:$0]  %s210_s1, 256, %s28_s17, [#allocation6], %s172_s12, %s172_s12, %s173_s13  }
  0x19   :  { %165 = dma.done.wait [#allocation3], 256  }
  0x1a   :  { %166 = vsyncadd [#allocation3], 4294967040 }
  0x1b   :  { %167 = dma.done.wait [#allocation6], 256  }
  0x1c   :  { %168 = vsyncadd [#allocation6], 4294967040  ;;  %v40_v0 = vld [vmem:[#allocation2] sm:$0xff]  ;;  %v42_v1 = vld [vmem:[#allocation5] sm:$0xff]  ;;  %s175_s0 = smov [#allocation7]  }
  0x1d   :  { %v41_v2 = vld [vmem:[#allocation2 + $0x8] sm:$0xff]  ;;  %v92_v3 = vtrunc.f32 %v42_v1  ;;  %v43_v4 = vld [vmem:[#allocation5 + $0x8] sm:$0xff]  ;;  %v48_v5 = vsub.f32 1.0, %v40_v0  ;;  %s79_s1 = sshll.u32 %s175_s0, 4  ;;  %s80_s1 = int_to_ptr.vmem [resolvable:$true] %s79_s1 }
  0x1e   :  { %v94_v6 = vtrunc.f32 %v43_v4  ;;  %v49_v8 = vsub.f32 1.0, %v41_v2  ;;  %s145_s21 = scalar_lea.vmem %s80_s1, 256  ;;  %p150_p11 = scmp.lt.s32.totalorder %s80_s1, %s80_s1 }
  0x1f   :  { %v93_v7 = vcvt.f32.s32 %v92_v3  ;;  %p146_p10 = scmp.ne.s32.totalorder %s80_s1, %s145_s21  ;;  %p151_p12 = scmp.lt.s32.totalorder %s145_s21, %s145_s21 }
  0x20   :  { %v95_v9 = vcvt.f32.s32 %v94_v6 }
  0x21   :  { %vm46_vm0 = vcmp.eq.s32.totalorder %v93_v7, 1  ;;  %p152_p13 = por %p151_p12, %p150_p11 }
  0x22   :  { %v50_v10 = vsel %vm46_vm0, %v40_v0, %v48_v5  ;;  %vm47_vm1 = vcmp.eq.s32.totalorder %v95_v9, 1 }
  0x23   :  { %v52_v11 = vmax.f32 %v50_v10, 1e-08  ;;  %v51_v12 = vsel %vm47_vm1, %v41_v2, %v49_v8  ;;  %p153_p0 = pnand %p152_p13, %p146_p10 }
  0x24   :  { %v53_v13 = vmax.f32 %v51_v12, 1e-08 }
  0x25   :  { %v54_v14 = vmin.f32 %v52_v11, 1.0 }
  0x26   :  { %v55_v15 = vmin.f32 %v53_v13, 1.0 }
  0x27   :  { %v56_v16 = vsub.f32 1.0, %v54_v14  ;;  %101 = vlog2.f32 %v54_v14 }
  0x28   :  { %v57_v17 = vsub.f32 1.0, %v55_v15  ;;  %103 = vlog2.f32 %v55_v15 }
  0x29   :  { %v58_v18 = vmul.f32 %v56_v16, %v56_v16 }
  0x2a   :  { %v59_v19 = vmul.f32 %v57_v17, %v57_v17 }
  0x2b   :  { %vm60_vm2 = vcmp.lt.f32.partialorder %v58_v18, 0.9 }
  0x2c   :  { %vm61_vm3 = vcmp.lt.f32.partialorder %v59_v19, 0.9  ;;  %v62_v20 = vsel %vm60_vm2, %v58_v18, 0.0 }
  0x2d   :  { %v63_v21 = vsel %vm61_vm3, %v59_v19, 0.0  ;;  %v64_v22 = vsub.f32 0.0, %v62_v20 }
  0x2e   :  { %v65_v24 = vsub.f32 0.0, %v63_v21 }
  0x34   :  { %v102_v23 = vpop.eup %101 }
  0x35   :  { %v104_v25 = vpop.eup %103  ;;  %v67_v26 = vmul.f32 0.6931472, %v102_v23 }
  0x36   :  { %v69_v27 = vmul.f32 0.6931472, %v104_v25 }
  0x37   :  { %v70_v28 = vmul.f32 %v67_v26, %v64_v22 }
  0x38   :  { %v71_v29 = vmul.f32 %v69_v27, %v65_v24 }
  0x39   :  { %72 = vst [vmem:[#allocation7] sm:$0xff] %v70_v28 }
  0x3a   :  { %73 = vst [vmem:[#allocation7 + $0x8] sm:$0xff] %v71_v29 }
  0x3b   :  { %156 = shalt.err (!%p153_p0)
}
  0x3c   :  { %85 = dma.vmem_to_hbm [thread:$0]  %s80_s1, 256, %s211_s2, [#allocation4], %s172_s12, %s172_s12, %s173_s13  }
  0x3d   :  { %169 = dma.done.wait [#allocation4], 256  }
  0x3e   :  { %170 = vsyncadd [#allocation4], 4294967040 }
  0x3f   :  { %89 = vsyncpa [#allocation3], 1 }
  0x40   :  { %90 = vsyncpa [#allocation6], 1 }
  0x41   :  { %91 = vsyncpa [#allocation4], 1 }

</bundles_post_ra>
